<compile_context>
chip_gen: v5e
topology: v5e:2x2
jax: 0.10.0
libtpu: 0.0.40
codegen_flags: <defaults>
</compile_context>

<pallas_src>
import functools

import jax
import jax.numpy as jnp
from jax.experimental import pallas as pl
from jax.experimental.pallas import tpu as pltpu

# ----------------------------- config (deterministic, in-script) ------------------------
NUM_CLASSES = 7          # number of object categories (no-object = NUM_CLASSES)
FOCAL_ALPHA = 0.25       # cfg.MODEL.SparseRCNN.ALPHA
FOCAL_GAMMA = 2.0        # cfg.MODEL.SparseRCNN.GAMMA
USE_FOCAL = True
LOSSES = ["labels", "boxes"]

B = 2                    # batch
Q = 8                    # number of proposals / queries
N_TGT = 3                # ground-truth boxes per image
IMG_W, IMG_H = 128.0, 128.0

_LANE = 128


# ----------------------------- fused Pallas kernel ---------------------------------------
def _set_criterion_kernel(slab_ref, out_ref, *, rc, n_elem, off_labels, off_boxes, off_img,
                          inv_nb, alpha, gamma):
    """Fused SparseRCNN losses on one lane-dense input slab.

    slab_ref : (rows, 128) f32 VMEM
        rows [0, rc)                         flattened pred_logits (B*Q*C, lane-packed)
        rows [off_labels, off_labels + rc)   flattened one-hot labels
        rows [off_boxes,  off_boxes  + 8)    box rows: 0..3 src xyxy, 4..7 tgt xyxy
                                             (matched pairs on lanes, pad = unit boxes)
        rows [off_img,    off_img    + 4)    per-pair image size xyxy (pad = 1.0)
    out_ref : (3,) f32 SMEM   [loss_ce, loss_giou, loss_bbox]
    """
    # ---------------- sigmoid focal classification loss ----------------
    x = slab_ref[0:rc, :]
    t = slab_ref[off_labels:off_labels + rc, :]

    # lane-padding mask generated in-kernel (compile-time-known pattern, no HBM traffic)
    row = jax.lax.broadcasted_iota(jnp.int32, (rc, _LANE), 0)
    lane = jax.lax.broadcasted_iota(jnp.int32, (rc, _LANE), 1)
    m = (row * _LANE + lane < n_elem).astype(jnp.float32)
    # TODO(synk): fold a (B,Q) ignore-region valid_mask into `m` here if it ever
    #             becomes non-trivial.

    # one exp per element; both the stable BCE term and sigmoid are derived from it
    e = jnp.exp(-jnp.abs(x))
    ce = jnp.maximum(x, 0.0) - x * t + jnp.log(1.0 + e)     # e in (0,1] -> log is exact enough
    inv_1pe = 1.0 / (1.0 + e)
    prob = jnp.where(x >= 0.0, inv_1pe, e * inv_1pe)        # sigmoid(x)
    p_t = prob * t + (1.0 - prob) * (1.0 - t)
    one_m_pt = 1.0 - p_t
    if gamma == 2.0:                                        # trace-time constant
        focal_w = one_m_pt * one_m_pt                       # square, no pow (log+exp)
    else:
        focal_w = jnp.power(one_m_pt, gamma)
    alpha_t = alpha * t + (1.0 - alpha) * (1.0 - t)
    loss_ce = jnp.sum(alpha_t * ce * focal_w * m) * inv_nb

    # ---------------- matched-box losses (coords on sublanes, pairs on lanes) ----------
    bx = slab_ref[off_boxes:off_boxes + 8, :]               # (8, L)
    img = slab_ref[off_img:off_img + 4, :]                  # (4, L)

    src = bx[0:4, :]                                        # [x1, y1, x2, y2]
    tgt = bx[4:8, :]
    mx = jnp.maximum(src, tgt)
    mn = jnp.minimum(src, tgt)
    lo = jax.lax.broadcasted_iota(jnp.int32, (4, _LANE), 0) < 2   # rows 0,1 = (x1, y1)
    inter_c = jnp.where(lo, mx, mn)                         # intersection corners
    encl_c = jnp.where(lo, mn, mx)                          # enclosing-box corners

    # widths/heights of all four corner groups with a single 2-sublane roll;
    # valid rows of d are {0,1, 4,5, 8,9, 12,13} = (w, h) of [src, tgt, inter, encl]
    corners = jnp.concatenate([src, tgt, inter_c, encl_c], axis=0)   # (16, L)
    d = pltpu.roll(corners, shift=14, axis=0) - corners              # roll by -2 sublanes
    d = jnp.maximum(d, 0.0)     # clamp: required for inter; no-op for valid src/tgt boxes
    prod = d * pltpu.roll(d, shift=15, axis=0)                       # row 4k -> w_k * h_k

    area_s = prod[0:1, :]
    area_t = prod[4:5, :]
    inter = prod[8:9, :]
    carea = prod[12:13, :]
    union = area_s + area_t - inter
    # exact divides (matches torch generalized_box_iou); padded lanes carry identical
    # unit boxes (union = carea = 1, giou = 1) so they contribute exactly 0 below
    iou = inter / union
    giou = iou - (carea - union) / carea
    loss_giou = jnp.sum(1.0 - giou) * inv_nb

    # |s/img - t/img| == |s - t| / img ; padded lanes have s == t -> 0 contribution
    l1 = jnp.abs(src - tgt) * pl.reciprocal(img, approx=True)
    loss_bbox = jnp.sum(l1) * inv_nb

    out_ref[0] = loss_ce
    out_ref[1] = loss_giou
    out_ref[2] = loss_bbox


# ----------------------------- wrapper ----------------------------------------------------
def fused_set_criterion_losses(slab, *, rc, n_elem, off_labels, off_boxes, off_img, inv_nb):
    kernel = functools.partial(
        _set_criterion_kernel, rc=rc, n_elem=n_elem, off_labels=off_labels,
        off_boxes=off_boxes, off_img=off_img, inv_nb=inv_nb,
        alpha=FOCAL_ALPHA, gamma=FOCAL_GAMMA)
    out = pl.pallas_call(
        kernel,
        out_shape=jax.ShapeDtypeStruct((3,), jnp.float32),
        in_specs=[pl.BlockSpec(memory_space=pltpu.MemorySpace.VMEM)],
        out_specs=pl.BlockSpec(memory_space=pltpu.MemorySpace.SMEM),
    )(slab)
    return out[0], out[1], out[2]


# ----------------------------- SetCriterion forward (JAX glue + fused Pallas kernel) ------
def set_criterion_forward(outputs, targets):
    pred_logits = outputs["pred_logits"]                    # (B, Q, C)
    pred_boxes = outputs["pred_boxes"]                      # (B, Q, 4) xyxy
    Bn, Qn, Cn = pred_logits.shape

    # dense target stacking (all images carry the same target count in this script)
    # TODO(synk): variable per-image target counts need padding + a per-pair mask.
    tgt_labels = jnp.stack([t["labels"] for t in targets])               # (B, N)
    tgt_boxes = jnp.stack([t["boxes_xyxy"] for t in targets])            # (B, N, 4)
    tgt_imgsz = jnp.stack([t["image_size_xyxy_tgt"] for t in targets])   # (B, N, 4)
    Nt = tgt_labels.shape[1]
    M = Bn * Nt                                             # matched pairs
    assert M <= _LANE, "matched pairs must fit one lane row at this problem size"

    # TODO(synk): Hungarian matching; deterministic identity matching (target j <- proposal j)
    num_boxes = float(max(M, 1))

    # ---- classification targets (vectorized) ----
    target_classes = jnp.full((Bn, Qn), NUM_CLASSES, dtype=jnp.int32)
    target_classes = target_classes.at[:, :Nt].set(tgt_labels)
    # ignore-region masking: no ignore boxes in synthetic targets -> all valid
    valid_mask = jnp.ones((Bn, Qn), dtype=jnp.float32)
    # no-object class (== NUM_CLASSES) maps to the all-zero one-hot row
    labels_onehot = jax.nn.one_hot(target_classes, Cn, dtype=jnp.float32)

    # ---- matched box pairs (pair index rides the lane axis) ----
    src_boxes = pred_boxes[:, :Nt, :].reshape(M, 4).astype(jnp.float32)
    t_boxes = tgt_boxes.reshape(M, 4).astype(jnp.float32)
    img_sz = tgt_imgsz.reshape(M, 4).astype(jnp.float32)

    # ---- single lane-dense input slab -------------------------------------------------
    n_elem = Bn * Qn * Cn
    rc = -(-n_elem // _LANE)                                # lane-packed rows per field
    rc8 = -(-rc // 8) * 8                                   # 8-sublane-aligned region size
    off_labels = rc8
    off_boxes = 2 * rc8
    off_img = off_boxes + 8
    total_rows = off_img + 8                                # 4 img rows + 4 pad rows

    def lane_pack(a):
        flat = a.reshape(-1).astype(jnp.float32)
        flat = jnp.pad(flat, (0, rc * _LANE - n_elem))
        return flat.reshape(rc, _LANE)

    # pad lanes of the box rows with identical unit boxes (giou == 1, l1 == 0)
    pad_col = jnp.array([0.0, 0.0, 1.0, 1.0, 0.0, 0.0, 1.0, 1.0], jnp.float32)[:, None]
    boxes_rows = jnp.broadcast_to(pad_col, (8, _LANE))
    boxes_rows = boxes_rows.at[:, :M].set(jnp.concatenate([src_boxes.T, t_boxes.T], axis=0))
    img_rows = jnp.ones((4, _LANE), jnp.float32).at[:, :M].set(img_sz.T)

    slab = jnp.zeros((total_rows, _LANE), jnp.float32)
    slab = slab.at[0:rc].set(lane_pack(pred_logits))
    slab = slab.at[off_labels:off_labels + rc].set(lane_pack(labels_onehot))
    slab = slab.at[off_boxes:off_boxes + 8].set(boxes_rows)
    slab = slab.at[off_img:off_img + 4].set(img_rows)

    loss_ce, loss_giou, loss_bbox = fused_set_criterion_losses(
        slab, rc=rc, n_elem=n_elem, off_labels=off_labels,
        off_boxes=off_boxes, off_img=off_img, inv_nb=1.0 / num_boxes)

    losses = {}
    if "labels" in LOSSES:
        losses["loss_ce"] = loss_ce
        losses["valid_ratio"] = jnp.mean(valid_mask)
    if "boxes" in LOSSES:
        losses["loss_giou"] = loss_giou
        losses["loss_bbox"] = loss_bbox
    return losses


# ----------------------------- main -------------------------------------------------------
if __name__ == "__main__":
    key = jax.random.PRNGKey(0)
    k_logit, k_pcxy, k_pwh, k_tcxy, k_twh, k_lab = jax.random.split(key, 6)

    # model outputs
    pred_logits = jax.random.normal(k_logit, (B, Q, NUM_CLASSES), dtype=jnp.float32)

    def make_xyxy(kc, kw, shape):
        cxy = jax.random.uniform(kc, shape + (2,), minval=0.3, maxval=0.7)
        wh = jax.random.uniform(kw, shape + (2,), minval=0.1, maxval=0.3)
        x1y1 = (cxy - 0.5 * wh) * jnp.array([IMG_W, IMG_H])
        x2y2 = (cxy + 0.5 * wh) * jnp.array([IMG_W, IMG_H])
        return jnp.concatenate([x1y1, x2y2], axis=-1).astype(jnp.float32)

    pred_boxes = make_xyxy(k_pcxy, k_pwh, (B, Q))           # (B, Q, 4) xyxy

    outputs = {"pred_logits": pred_logits, "pred_boxes": pred_boxes}

    # targets: list of dicts, one per image
    tgt_boxes_all = make_xyxy(k_tcxy, k_twh, (B, N_TGT))    # (B, N_TGT, 4)
    tgt_labels_all = jax.random.randint(k_lab, (B, N_TGT), 0, NUM_CLASSES).astype(jnp.int32)
    img_size_row = jnp.array([IMG_W, IMG_H, IMG_W, IMG_H], dtype=jnp.float32)

    targets = []
    for b in range(B):
        targets.append({
            "labels": tgt_labels_all[b],
            "boxes_xyxy": tgt_boxes_all[b],
            "image_size_xyxy_tgt": jnp.tile(img_size_row[None, :], (N_TGT, 1)),
        })

    losses = set_criterion_forward(outputs, targets)
    losses = jax.tree_util.tree_map(jax.block_until_ready, losses)

    for k, v in losses.items():
        assert jnp.isfinite(v), f"non-finite loss {k}"
    print("KERNEL_OK")
</pallas_src>

<mosaic_0001>
module attributes {stable_mosaic.version = 11 : i64} {
  func.func @_set_criterion_kernel(%arg0: memref<32x128xf32, #tpu.memory_space<vmem>>, %arg1: memref<3xf32, #tpu.memory_space<smem>>) attributes {dimension_semantics = [], scalar_prefetch = 0 : i64, scratch_operands = 0 : i64, tpu.core_type = #tpu.core_type<tc>} {
    %c0 = arith.constant 0 : index
    %c0_0 = arith.constant 0 : index
    %0 = vector.load %arg0[%c0, %c0_0] : memref<32x128xf32, #tpu.memory_space<vmem>>, vector<1x128xf32>
    %c8 = arith.constant 8 : index
    %c0_1 = arith.constant 0 : index
    %1 = vector.load %arg0[%c8, %c0_1] : memref<32x128xf32, #tpu.memory_space<vmem>>, vector<1x128xf32>
    %2 = tpu.iota {dimensions = array<i32: 0>} : vector<1x128xi32>
    %3 = tpu.iota {dimensions = array<i32: 1>} : vector<1x128xi32>
    %c128_i32 = arith.constant 128 : i32
    %4 = vector.broadcast %c128_i32 : i32 to vector<1x128xi32>
    %5 = arith.muli %2, %4 : vector<1x128xi32>
    %6 = arith.addi %5, %3 : vector<1x128xi32>
    %c112_i32 = arith.constant 112 : i32
    %7 = vector.broadcast %c112_i32 : i32 to vector<1x128xi32>
    %8 = arith.cmpi slt, %6, %7 : vector<1x128xi32>
    %9 = arith.extui %8 : vector<1x128xi1> to vector<1x128xi32>
    %10 = arith.sitofp %9 : vector<1x128xi32> to vector<1x128xf32>
    %11 = math.absf %0 : vector<1x128xf32>
    %cst = arith.constant 0.000000e+00 : f32
    %12 = vector.broadcast %cst : f32 to vector<1x128xf32>
    %13 = arith.subf %12, %11 : vector<1x128xf32>
    %14 = math.exp %13 : vector<1x128xf32>
    %cst_2 = arith.constant 0.000000e+00 : f32
    %15 = vector.broadcast %cst_2 : f32 to vector<1x128xf32>
    %16 = arith.maximumf %0, %15 : vector<1x128xf32>
    %17 = arith.mulf %0, %1 : vector<1x128xf32>
    %18 = arith.subf %16, %17 : vector<1x128xf32>
    %cst_3 = arith.constant 1.000000e+00 : f32
    %19 = vector.broadcast %cst_3 : f32 to vector<1x128xf32>
    %20 = arith.addf %19, %14 : vector<1x128xf32>
    %21 = math.log %20 : vector<1x128xf32>
    %22 = arith.addf %18, %21 : vector<1x128xf32>
    %cst_4 = arith.constant 1.000000e+00 : f32
    %23 = vector.broadcast %cst_4 : f32 to vector<1x128xf32>
    %24 = arith.addf %23, %14 : vector<1x128xf32>
    %cst_5 = arith.constant 1.000000e+00 : f32
    %25 = vector.broadcast %cst_5 : f32 to vector<1x128xf32>
    %26 = arith.divf %25, %24 : vector<1x128xf32>
    %cst_6 = arith.constant 0.000000e+00 : f32
    %27 = vector.broadcast %cst_6 : f32 to vector<1x128xf32>
    %28 = arith.cmpf oge, %0, %27 : vector<1x128xf32>
    %29 = arith.mulf %14, %26 : vector<1x128xf32>
    %30 = arith.select %28, %26, %29 : vector<1x128xi1>, vector<1x128xf32>
    %31 = arith.mulf %30, %1 : vector<1x128xf32>
    %cst_7 = arith.constant 1.000000e+00 : f32
    %32 = vector.broadcast %cst_7 : f32 to vector<1x128xf32>
    %33 = arith.subf %32, %30 : vector<1x128xf32>
    %cst_8 = arith.constant 1.000000e+00 : f32
    %34 = vector.broadcast %cst_8 : f32 to vector<1x128xf32>
    %35 = arith.subf %34, %1 : vector<1x128xf32>
    %36 = arith.mulf %33, %35 : vector<1x128xf32>
    %37 = arith.addf %31, %36 : vector<1x128xf32>
    %cst_9 = arith.constant 1.000000e+00 : f32
    %38 = vector.broadcast %cst_9 : f32 to vector<1x128xf32>
    %39 = arith.subf %38, %37 : vector<1x128xf32>
    %40 = arith.mulf %39, %39 : vector<1x128xf32>
    %cst_10 = arith.constant 2.500000e-01 : f32
    %41 = vector.broadcast %cst_10 : f32 to vector<1x128xf32>
    %42 = arith.mulf %41, %1 : vector<1x128xf32>
    %cst_11 = arith.constant 1.000000e+00 : f32
    %43 = vector.broadcast %cst_11 : f32 to vector<1x128xf32>
    %44 = arith.subf %43, %1 : vector<1x128xf32>
    %cst_12 = arith.constant 7.500000e-01 : f32
    %45 = vector.broadcast %cst_12 : f32 to vector<1x128xf32>
    %46 = arith.mulf %45, %44 : vector<1x128xf32>
    %47 = arith.addf %42, %46 : vector<1x128xf32>
    %48 = arith.mulf %47, %22 : vector<1x128xf32>
    %49 = arith.mulf %48, %40 : vector<1x128xf32>
    %50 = arith.mulf %49, %10 : vector<1x128xf32>
    %51 = vector.shape_cast %50 : vector<1x128xf32> to vector<1x1x128xf32>
    %cst_13 = arith.constant dense<0.000000e+00> : vector<1xf32>
    %52 = vector.multi_reduction <add>, %51, %cst_13 [1, 2] : vector<1x1x128xf32> to vector<1xf32>
    %53 = vector.shape_cast %52 : vector<1xf32> to vector<1x1x1xf32>
    %54 = vector.extract %53[0, 0, 0] : f32 from vector<1x1x1xf32>
    %cst_14 = arith.constant 0.166666672 : f32
    %55 = arith.mulf %54, %cst_14 : f32
    %c16 = arith.constant 16 : index
    %c0_15 = arith.constant 0 : index
    %56 = vector.load %arg0[%c16, %c0_15] : memref<32x128xf32, #tpu.memory_space<vmem>>, vector<8x128xf32>
    %c24 = arith.constant 24 : index
    %c0_16 = arith.constant 0 : index
    %57 = vector.load %arg0[%c24, %c0_16] : memref<32x128xf32, #tpu.memory_space<vmem>>, vector<4x128xf32>
    %58 = vector.extract_strided_slice %56 {offsets = [0, 0], sizes = [4, 128], strides = [1, 1]} : vector<8x128xf32> to vector<4x128xf32>
    %59 = vector.extract_strided_slice %56 {offsets = [4, 0], sizes = [4, 128], strides = [1, 1]} : vector<8x128xf32> to vector<4x128xf32>
    %60 = arith.maximumf %58, %59 : vector<4x128xf32>
    %61 = arith.minimumf %58, %59 : vector<4x128xf32>
    %62 = tpu.iota {dimensions = array<i32: 0>} : vector<4x128xi32>
    %c2_i32 = arith.constant 2 : i32
    %63 = vector.broadcast %c2_i32 : i32 to vector<4x128xi32>
    %64 = arith.cmpi slt, %62, %63 : vector<4x128xi32>
    %65 = arith.select %64, %60, %61 : vector<4x128xi1>, vector<4x128xf32>
    %66 = arith.select %64, %61, %60 : vector<4x128xi1>, vector<4x128xf32>
    %67 = tpu.concatenate %58, %59, %65, %66 in 0 : vector<4x128xf32>, vector<4x128xf32>, vector<4x128xf32>, vector<4x128xf32> -> vector<16x128xf32>
    %c14_i32 = arith.constant 14 : i32
    %68 = tpu.dynamic_rotate %67 by %c14_i32 dim 0 : vector<16x128xf32>, i32 -> vector<16x128xf32>
    %69 = arith.subf %68, %67 : vector<16x128xf32>
    %cst_17 = arith.constant 0.000000e+00 : f32
    %70 = vector.broadcast %cst_17 : f32 to vector<16x128xf32>
    %71 = arith.maximumf %69, %70 : vector<16x128xf32>
    %c15_i32 = arith.constant 15 : i32
    %72 = tpu.dynamic_rotate %71 by %c15_i32 dim 0 : vector<16x128xf32>, i32 -> vector<16x128xf32>
    %73 = arith.mulf %71, %72 : vector<16x128xf32>
    %74 = vector.extract_strided_slice %73 {offsets = [0, 0], sizes = [1, 128], strides = [1, 1]} : vector<16x128xf32> to vector<1x128xf32>
    %75 = vector.extract_strided_slice %73 {offsets = [4, 0], sizes = [1, 128], strides = [1, 1]} : vector<16x128xf32> to vector<1x128xf32>
    %76 = vector.extract_strided_slice %73 {offsets = [8, 0], sizes = [1, 128], strides = [1, 1]} : vector<16x128xf32> to vector<1x128xf32>
    %77 = vector.extract_strided_slice %73 {offsets = [12, 0], sizes = [1, 128], strides = [1, 1]} : vector<16x128xf32> to vector<1x128xf32>
    %78 = arith.addf %74, %75 : vector<1x128xf32>
    %79 = arith.subf %78, %76 : vector<1x128xf32>
    %80 = arith.divf %76, %79 : vector<1x128xf32>
    %81 = arith.subf %77, %79 : vector<1x128xf32>
    %82 = arith.divf %81, %77 : vector<1x128xf32>
    %83 = arith.subf %80, %82 : vector<1x128xf32>
    %cst_18 = arith.constant 1.000000e+00 : f32
    %84 = vector.broadcast %cst_18 : f32 to vector<1x128xf32>
    %85 = arith.subf %84, %83 : vector<1x128xf32>
    %86 = vector.shape_cast %85 : vector<1x128xf32> to vector<1x1x128xf32>
    %cst_19 = arith.constant dense<0.000000e+00> : vector<1xf32>
    %87 = vector.multi_reduction <add>, %86, %cst_19 [1, 2] : vector<1x1x128xf32> to vector<1xf32>
    %88 = vector.shape_cast %87 : vector<1xf32> to vector<1x1x1xf32>
    %89 = vector.extract %88[0, 0, 0] : f32 from vector<1x1x1xf32>
    %cst_20 = arith.constant 0.166666672 : f32
    %90 = arith.mulf %89, %cst_20 : f32
    %91 = arith.subf %58, %59 : vector<4x128xf32>
    %92 = math.absf %91 : vector<4x128xf32>
    %93 = tpu.reciprocal %57 {approx = true} : vector<4x128xf32> -> vector<4x128xf32>
    %94 = arith.mulf %92, %93 : vector<4x128xf32>
    %95 = vector.shape_cast %94 : vector<4x128xf32> to vector<1x4x128xf32>
    %cst_21 = arith.constant dense<0.000000e+00> : vector<1xf32>
    %96 = vector.multi_reduction <add>, %95, %cst_21 [1, 2] : vector<1x4x128xf32> to vector<1xf32>
    %97 = vector.shape_cast %96 : vector<1xf32> to vector<1x1x1xf32>
    %98 = vector.extract %97[0, 0, 0] : f32 from vector<1x1x1xf32>
    %cst_22 = arith.constant 0.166666672 : f32
    %99 = arith.mulf %98, %cst_22 : f32
    %c0_23 = arith.constant 0 : index
    %100 = memref.load %arg1[%c0_23] : memref<3xf32, #tpu.memory_space<smem>>
    memref.store %55, %arg1[%c0_23] : memref<3xf32, #tpu.memory_space<smem>>
    %c1 = arith.constant 1 : index
    %101 = memref.load %arg1[%c1] : memref<3xf32, #tpu.memory_space<smem>>
    memref.store %90, %arg1[%c1] : memref<3xf32, #tpu.memory_space<smem>>
    %c2 = arith.constant 2 : index
    %102 = memref.load %arg1[%c2] : memref<3xf32, #tpu.memory_space<smem>>
    memref.store %99, %arg1[%c2] : memref<3xf32, #tpu.memory_space<smem>>
    return
  }
}

</mosaic_0001>

<bundles_post_ra>
// kernel: tpu_custom_call.1
= control target key start
LH: loop header
LB: loop body
LE: loop exit
PB: predicated region body
PF: predicated region fallthrough
CT: control target
= control target key end

     0   :  { %6 = vsyncpa [#allocation3], 0  ;;  %s341_s0 = inlined_call_operand.hbm [shape: f32[32,128], index: 0, kind: input, shape index: {}]   ;;  %s342_s1 = inlined_call_operand.hbm [shape: f32[3], index: 1, kind: output, shape index: {}]  }
   0x1   :  { %7 = vsyncpa [#allocation4], 0  ;;  %s12_s8 = sshll.u32 %s341_s0, 4  ;;  %s277_s9 = smov [#allocation2]   ;;  %s13_s8 = int_to_ptr.hbm [resolvable:$true] %s12_s8 }
   0x2   :  { %s14_s10 = sshll.u32 %s277_s9, 4  ;;  %s278_s11 = smov 128   ;;  %s15_s10 = int_to_ptr.vmem [resolvable:$true] %s14_s10 }
   0x3   :  { %s279_s12 = smov 8  }
   0x4   :  { %20 = dma.hbm_to_vmem [thread:$0]  %s13_s8, 512, %s15_s10, [#allocation3], %s278_s11, %s278_s11, %s279_s12  }
   0x5   :  { %273 = dma.done.wait [#allocation3], 512  }
   0x6   :  { %274 = vsyncadd [#allocation3], 4294966784  ;;  %v27_v0 = vlaneseq  ;;  %v297_v2 = vld [vmem:[#allocation2] sm:$0x1]  ;;  %v90_v3 = vld [vmem:[#allocation2 + $0x10] sm:$0xff]  ;;  %vm103_vm1 = vcmask 1043456  }
   0x7   :  { %v36_v4 = vand.u32 2147483647, %v297_v2  ;;  %v93_v5 = vrot.slane %v90_v3, 4  ;;  %v105_v13 = vrot.slane %v90_v3, 2  ;;  %v91_v16 = vld [vmem:[#allocation2 + $0x18] sm:$0xf] }
   0x8   :  { %v295_v1 = vshrl.u32 %v27_v0, 7  ;;  %v30_v43 = vand.u32 127, %v27_v0  ;;  %v26_v48 = vld [vmem:[#allocation2 + $0x8] sm:$0x1]  ;;  %v40_v49 = vmax.f32 %v297_v2, 0.0  ;;  %vm62_vm10 = vcmp.ge.f32.partialorder %v297_v2, 0.0 }
   0x9   :  { %v37_v6 = vsub.f32 0.0, %v36_v4  ;;  %v95_v7 = vmax.f32 %v90_v3, %v93_v5  ;;  %v96_v8 = vmin.f32 %v90_v3, %v93_v5  ;;  %v176_v23 = vsub.f32 %v90_v3, %v93_v5  ;;  %s202_s16 = sshll.u32 %s342_s1, 4  ;;  %s281_s21 = smov [#allocation5]   ;;  %s203_s16 = int_to_ptr.hbm [resolvable:$true] %s202_s16 }
   0xa   :  { %vm97_vm0 = vcmp.lt.s32.totalorder %v295_v1, 2  ;;  %vm107_vm2 = vcmp.lt.s32.totalorder %v295_v1, 6  ;;  %vm116_vm3 = vcmp.lt.s32.totalorder %v295_v1, 7  ;;  %v31_v44 = vmul.u32 128, %v295_v1 }
   0xb   :  { %v38_v9 = vmul.f32 1.442695, %v37_v6  ;;  %v98_v10 = vsel %vm97_vm0, %v95_v7, %v96_v8  ;;  %v99_v11 = vsel %vm97_vm0, %v96_v8, %v95_v7  ;;  %v177_v26 = vand.u32 2147483647, %v176_v23 }
   0xc   :  { %v101_v12 = vrot.slane %v99_v11, 4  ;;  %v41_v52 = vmul.f32 %v26_v48, %v297_v2  ;;  %v32_v56 = vadd.s32 %v31_v44, %v30_v43  ;;  %v67_v62 = vsub.f32 1.0, %v26_v48 }
   0xd   :  { %225 = vpow2.f32 %v38_v9 }
   0xe   :  { %v104_v14 = vsel %vm103_vm1, %v98_v10, %v101_v12  ;;  %227 = vrcp.f32 %v91_v16  ;;  %v42_v0 = vsub.f32 %v40_v49, %v41_v52  ;;  %v73_v7 = vmul.f32 0.75, %v67_v62 }
   0xf   :  { %v106_v15 = vrot.slane %v104_v14, 2 }
  0x11   :  { %v108_v17 = vsel %vm107_vm2, %v105_v13, %v106_v15  ;;  %v109_v18 = vsel %vm107_vm2, %v106_v15, %v105_v13  ;;  %vm78_vm2 = vcmask 1040384  }
  0x12   :  { %v110_v20 = vsub.f32 %v108_v17, %v90_v3  ;;  %v111_v21 = vsub.f32 %v109_v18, %v104_v14  ;;  %v72_v3 = vmul.f32 0.25, %v26_v48 }
  0x13   :  { %v226_v19 = vpop.eup %225 }
  0x14   :  { %v43_v22 = vadd.f32 1.0, %v226_v19  ;;  %v112_v24 = vmax.f32 %v110_v20, 0.0  ;;  %v113_v25 = vmax.f32 %v111_v21, 0.0  ;;  %v228_v28 = vpop.eup %227 }
  0x15   :  { %v179_v30 = vmul.f32 %v228_v28, %v177_v26 }
  0x16   :  { %229 = vrcp.f32 %v43_v22  ;;  %v114_v27 = vrot.slane %v112_v24, 1  ;;  %v115_v29 = vrot.slane %v113_v25, 1  ;;  %v58_v39 = vand.u32 2147483648, %v43_v22 }
  0x17   :  { %v180_v33 = vsel %vm103_vm1, %v179_v30, 0.0  ;;  %vm52_vm4 = vweird.f32 %v43_v22  ;;  %v56_v42 = vand.u32 2147483647, %v43_v22  ;;  %vm33_vm1 = vcmp.lt.s32.totalorder %v32_v56, 112 }
  0x18   :  { %v117_v31 = vsel %vm116_vm3, %v114_v27, %v115_v29  ;;  %v118_v32 = vsel %vm116_vm3, %v115_v29, %v114_v27  ;;  %181 = vadd.xlane.f32.xlu1 %v180_v33  ;;  %v59_v51 = vor.u32 1.1754944e-38, %v58_v39 }
  0x19   :  { %v119_v34 = vmul.f32 %v117_v31, %v112_v24  ;;  %v305_v35 = vmul.f32 %v118_v32, %v113_v25  ;;  %vm57_vm7 = vcmp.eq.f32.partialorder %v56_v42, 8.507059e+37 }
  0x1b   :  { %v122_v37 = vrot.slane %v119_v34, 4  ;;  %231 = vrcp.f32 %v305_v35  ;;  %v154_v57 = vand.u32 2147483647, %v305_v35  ;;  %v156_v58 = vand.u32 2147483648, %v305_v35 }
  0x1c   :  { %v230_v36 = vpop.eup %229  ;;  %233 = vlog2.f32 %v43_v22  ;;  %vm150_vm8 = vweird.f32 %v305_v35 }
  0x1d   :  { %v48_v38 = vmul.f32 %v230_v36, %v43_v22  ;;  %v124_v40 = vadd.f32 %v122_v37, %v119_v34  ;;  %vm53_vm5 = vweird.f32 %v230_v36  ;;  %vm327_vm12 = vcmp.eq.f32.partialorder %v154_v57, 8.507059e+37 }
  0x1e   :  { %vm311_vm6 = vmor %vm52_vm4, %vm53_vm5  ;;  %v157_v10 = vor.u32 1.1754944e-38, %v156_v58  ;;  %v74_v22 = vadd.f32 %v73_v7, %v72_v3 }
  0x1f   :  { %v49_v41 = vsub.f32 1.0, %v48_v38  ;;  %v125_v45 = vsub.f32 %v124_v40, %v305_v35 }
  0x21   :  { %v50_v46 = vmul.f32 %v230_v36, %v49_v41  ;;  %v232_v47 = vpop.eup %231  ;;  %235 = vrcp.f32 %v125_v45  ;;  %v142_v63 = vrot.slane %v125_v45, 4  ;;  %vm131_vm13 = vweird.f32 %v125_v45 }
  0x22   :  { %v146_v54 = vmul.f32 %v232_v47, %v305_v35  ;;  %v234_v55 = vpop.eup %233  ;;  %vm151_vm9 = vweird.f32 %v232_v47  ;;  %v137_v15 = vand.u32 2147483648, %v125_v45  ;;  %v135_v18 = vand.u32 2147483647, %v125_v45 }
  0x23   :  { %v51_v53 = vadd.f32 %v230_v36, %v50_v46  ;;  %v45_v6 = vmul.f32 0.6931472, %v234_v55  ;;  %vm323_vm11 = vmor %vm150_vm8, %vm151_vm9  ;;  %v144_v16 = vsub.f32 %v305_v35, %v142_v63 }
  0x24   :  { %v147_v60 = vsub.f32 1.0, %v146_v54  ;;  %v138_v26 = vor.u32 1.1754944e-38, %v137_v15  ;;  %vm136_vm0 = vcmp.eq.f32.partialorder %v135_v18, 8.507059e+37 }
  0x25   :  { %v55_v59 = vsel %vm311_vm6, %v230_v36, %v51_v53  ;;  %v46_v20 = vadd.f32 %v45_v6, %v42_v0  ;;  %v280_v36 = vmov 0.0  }
  0x26   :  { %v60_v61 = vsel %vm57_vm7, %v59_v51, %v55_v59  ;;  %v148_v4 = vmul.f32 %v232_v47, %v147_v60  ;;  %v213_v37 = vsel %vm33_vm1, 1.0, %v280_v36 }
  0x27   :  { %v63_v1 = vmul.f32 %v226_v19, %v60_v61  ;;  %v236_v5 = vpop.eup %235  ;;  %v75_v30 = vmul.f32 %v74_v22, %v46_v20 }
  0x28   :  { %v127_v2 = vmul.f32 %v236_v5, %v125_v45  ;;  %v149_v12 = vadd.f32 %v232_v47, %v148_v4  ;;  %vm132_vm14 = vweird.f32 %v236_v5 }
  0x29   :  { %v64_v11 = vsel %vm62_vm10, %v60_v61, %v63_v1  ;;  %vm133_vm15 = vmor %vm131_vm13, %vm132_vm14 }
  0x2a   :  { %v65_v13 = vmul.f32 %v64_v11, %v26_v48  ;;  %v66_v14 = vsub.f32 1.0, %v64_v11  ;;  %v128_v17 = vsub.f32 1.0, %v127_v2  ;;  %v153_v19 = vsel %vm323_vm11, %v232_v47, %v149_v12 }
  0x2b   :  { %v158_v23 = vsel %vm327_vm12, %v157_v10, %v153_v19 }
  0x2c   :  { %v68_v21 = vmul.f32 %v67_v62, %v66_v14  ;;  %v129_v24 = vmul.f32 %v236_v5, %v128_v17  ;;  %v159_v27 = vmul.f32 %v158_v23, %v144_v16 }
  0x2e   :  { %v69_v25 = vadd.f32 %v68_v21, %v65_v13  ;;  %v130_v28 = vadd.f32 %v236_v5, %v129_v24  ;;  %v161_v34 = vrot.slane %v159_v27, 4 }
  0x30   :  { %v70_v29 = vsub.f32 1.0, %v69_v25  ;;  %v134_v31 = vsel %vm133_vm15, %v236_v5, %v130_v28 }
  0x31   :  { %v139_v33 = vsel %vm136_vm0, %v138_v26, %v134_v31 }
  0x32   :  { %v71_v32 = vmul.f32 %v70_v29, %v70_v29  ;;  %v140_v38 = vmul.f32 %v139_v33, %v305_v35 }
  0x34   :  { %v76_v39 = vmul.f32 %v75_v30, %v71_v32  ;;  %v163_v41 = vsub.f32 %v140_v38, %v161_v34 }
  0x36   :  { %v77_v40 = vmul.f32 %v213_v37, %v76_v39  ;;  %v164_v43 = vsub.f32 1.0, %v163_v41 }
  0x38   :  { %v79_v42 = vsel %vm78_vm2, %v77_v40, 0.0  ;;  %v165_v44 = vsel %vm78_vm2, %v164_v43, 0.0 }
  0x39   :  { %80 = vadd.xlane.f32.xlu0 %v79_v42 }
  0x41   :  { %166 = vadd.xlane.f32.xlu0 %v165_v44 }
  0x8b   :  { %v182_v45 = vpop.xlane.xlu1 %181 }
  0x8c   :  { %v183_v47 = vrot.slane %v182_v45, 4 }
  0x8e   :  { %v184_v50 = vadd.f32 %v183_v47, %v182_v45 }
  0x90   :  { %v185_v53 = vrot.slane %v184_v50, 2 }
  0x92   :  { %v186_v58 = vadd.f32 %v185_v53, %v184_v50 }
  0x94   :  { %v187_v61 = vrot.slane %v186_v58, 1 }
  0x96   :  { %v188_v0 = vadd.f32 %v187_v61, %v186_v58 }
  0xac   :  { %v81_v46 = vpop.xlane.xlu0 %80 }
  0xad   :  { %v82_v48 = vrot.slane %v81_v46, 4 }
  0xaf   :  { %v83_v49 = vadd.f32 %v82_v48, %v81_v46 }
  0xb1   :  { %v84_v51 = vrot.slane %v83_v49, 2 }
  0xb3   :  { %v85_v52 = vadd.f32 %v84_v51, %v83_v49 }
  0xb4   :  { %v167_v54 = vpop.xlane.xlu0 %166 }
  0xb5   :  { %v168_v35 = vrot.slane %v167_v54, 4  ;;  %v86_v55 = vrot.slane %v85_v52, 1 }
  0xb7   :  { %v169_v56 = vadd.f32 %v168_v35, %v167_v54  ;;  %v87_v57 = vadd.f32 %v86_v55, %v85_v52 }
  0xb9   :  { %v170_v59 = vrot.slane %v169_v56, 2  ;;  %214 = vpush %v87_v57 }
  0xbb   :  { %v171_v60 = vadd.f32 %v170_v59, %v169_v56 }
  0xbd   :  { %v172_v62 = vrot.slane %v171_v60, 1 }
  0xbf   :  { %v173_v63 = vadd.f32 %v172_v62, %v171_v60 }
  0xc1   :  { %216 = vpush %v173_v63 }
  0xc2   :  { %218 = vpush %v188_v0 }
  0xea   :  { %s215_s0 = spop %214 }
  0xeb   :  { %s89_s13 = smul.f32 0.16666667, %s215_s0 }
  0xed   :  { %192 = sst [smem:[#allocation5]] %s89_s13 }
  0xf2   :  { %s217_s17 = spop %216 }
  0xf3   :  { %s175_s18 = smul.f32 0.16666667, %s217_s17  ;;  %s219_s19 = spop %218 }
  0xf4   :  { %s190_s20 = smul.f32 0.16666667, %s219_s19 }
  0xf5   :  { %194 = sst [smem:[#allocation5 + $0x1]] %s175_s18 }
  0xf6   :  { %196 = sst [smem:[#allocation5 + $0x2]] %s190_s20 }
  0xf7   :  { %205 = dma.smem_to_hbm %s281_s21, 16, %s203_s16, [#allocation4]  }
  0xf8   :  { %275 = dma.done.wait [#allocation4], 16  }
  0xf9   :  { %276 = vsyncadd [#allocation4], 4294967280 }
  0xfa   :  { %210 = sfence }
  0xfb   :  { %211 = vsyncpa [#allocation3], 1 }
  0xfc   :  { %212 = vsyncpa [#allocation4], 1 }

</bundles_post_ra>
